<compile_context>
chip_gen: v7x
topology: tpu7x:2x2x1
jax: 0.10.0
libtpu: 0.0.40
codegen_flags: <defaults>
</compile_context>

<pallas_src>
import functools
import math

import jax
import jax.numpy as jnp
from jax.experimental import pallas as pl
from jax.experimental.pallas import tpu as pltpu

# `fn` here uses the tanh-approximate GELU (known-good Pallas lowering and what
# the fused reference below uses).  Set False for torch.nn.GELU()'s exact-erf
# default if the wrapped PyTorch fn requires it (EUP cost is comparable).
_APPROX_GELU = True


# --------------------------------------------------------------------------
# Kernels
# --------------------------------------------------------------------------
def _fused_resident_kernel(x_ref, w_ref, b_ref, o_ref):
    # x_ref: (TILE_M, H) x-dtype   w_ref: (H, H) bf16   b_ref: (1, H) f32
    x = x_ref[...]                                           # residual, original dtype
    y = jnp.dot(x.astype(jnp.bfloat16), w_ref[...],
                preferred_element_type=jnp.float32)          # MXU, f32 accumulation
    y = jax.nn.gelu(y + b_ref[...], approximate=_APPROX_GELU)
    o_ref[...] = (y + x).astype(o_ref.dtype)                 # residual add


def _fused_streamn_kernel(x_ref, xres_ref, w_ref, b_ref, o_ref):
    # Large-H fallback: W streamed by output columns.
    # x_ref: (TILE_M, H)  xres_ref: (TILE_M, TILE_N)  w_ref: (H, TILE_N) bf16
    y = jnp.dot(x_ref[...].astype(jnp.bfloat16), w_ref[...],
                preferred_element_type=jnp.float32)
    y = jax.nn.gelu(y + b_ref[...], approximate=_APPROX_GELU)
    o_ref[...] = (y + xres_ref[...]).astype(o_ref.dtype)


# --------------------------------------------------------------------------
# Host-side sizing helpers
# --------------------------------------------------------------------------
def _cdiv(a, b):
    return -(-a // b)


def _round_up(v, m):
    return ((v + m - 1) // m) * m


def _vmem_capacity_bytes():
    """Generation-aware VMEM capacity (falls back to v7x's 64 MiB per core)."""
    try:
        return int(pltpu.get_tpu_info().vmem_capacity_bytes)
    except Exception:
        return 64 << 20


def _resident_spec(block_shape, index_map):
    """BlockSpec for a VMEM-resident operand (constant index_map): a second
    pipeline buffer buys nothing, so request single-buffering when available."""
    try:
        return pl.BlockSpec(block_shape, index_map, pipeline_mode=pl.Buffered(1))
    except Exception:
        return pl.BlockSpec(block_shape, index_map)


def _choose_tile_m(m, h, elem_bytes, budget, row_align):
    """Row tile: multiple of `row_align` (or == m), fits VMEM alongside the
    single-buffered bf16 W, prefers an exact divisor of m (no masked partial
    block), and caps at ceil(m/2) so the grid has >=2 programs (v7x megacore)."""
    if m <= row_align:
        return m
    w_bytes = h * h * 2 + 2 * h * 4           # resident bf16 W + f32 bias
    per_row = 2 * 2 * h * elem_bytes          # double-buffered x and out rows
    cap = (budget - w_bytes) // per_row
    cap = min(cap, 1024)
    cap = min(cap, _round_up(_cdiv(m, 2), row_align))   # >= 2 grid programs
    cap = max(row_align, (cap // row_align) * row_align)
    for t in range(cap, row_align - 1, -row_align):     # prefer a divisor of m
        if m % t == 0:
            return t
    return cap                                          # cdiv grid, masked tail


# --------------------------------------------------------------------------
# Fused forward
# --------------------------------------------------------------------------
@jax.jit
def _residual_add_impl(x, w_bf16, b_f32):
    orig_shape = x.shape
    H = orig_shape[-1]
    M = math.prod(orig_shape[:-1]) if len(orig_shape) > 1 else 1
    x2 = x.reshape(M, H)

    elem = x2.dtype.itemsize
    row_align = max(8, 32 // elem)            # 8 for f32, 16 for bf16
    cap = _vmem_capacity_bytes()
    sizing_budget = int(cap * 0.75)
    vmem_limit = int(cap * 0.85)

    resident_need = (H * H * 2 + 2 * H * 4
                     + 2 * 2 * row_align * H * elem)   # W + b + minimal tiles

    if resident_need <= sizing_budget:
        # --- Default path: W fully resident in VMEM, rows pipelined. ---
        tm = _choose_tile_m(M, H, elem, sizing_budget, row_align)
        grid = (_cdiv(M, tm),)
        kernel = _fused_resident_kernel
        operands = (x2, w_bf16, b_f32)
        in_specs = [
            pl.BlockSpec((tm, H), lambda i: (i, 0)),              # x (pipelined)
            _resident_spec((H, H), lambda i: (0, 0)),             # W resident
            _resident_spec((1, H), lambda i: (0, 0)),             # b resident
        ]
        out_specs = pl.BlockSpec((tm, H), lambda i: (i, 0))
        dims = ("parallel",)
    else:
        # --- Large-H fallback: stream W by output columns; x row-tile stays
        # resident across the column axis; residual fed as a column-blocked
        # second view of x so every access stays in-bounds. ---
        tm = max(row_align, min(256, _round_up(_cdiv(M, 2), row_align)))
        tn = 512

        def _stream_cost(tm_, tn_):
            return (2 * tm_ * H * elem        # x row tile (double-buffered)
                    + 2 * H * tn_ * 2         # W column block (bf16)
                    + 2 * tm_ * tn_ * elem    # residual column block
                    + 2 * tm_ * tn_ * elem    # output block
                    + 2 * tn_ * 4)            # bias block

        while tn > 128 and _stream_cost(tm, tn) > sizing_budget:
            tn //= 2
        while tm > row_align and _stream_cost(tm, tn) > sizing_budget:
            tm = max(row_align, ((tm // 2) // row_align) * row_align)

        grid = (_cdiv(M, tm), _cdiv(H, tn))
        kernel = _fused_streamn_kernel
        operands = (x2, x2, w_bf16, b_f32)
        in_specs = [
            pl.BlockSpec((tm, H), lambda i, j: (i, 0)),    # x rows (resident over j)
            pl.BlockSpec((tm, tn), lambda i, j: (i, j)),   # residual columns
            pl.BlockSpec((H, tn), lambda i, j: (0, j)),    # W column block
            pl.BlockSpec((1, tn), lambda i, j: (0, j)),    # bias column block
        ]
        out_specs = pl.BlockSpec((tm, tn), lambda i, j: (i, j))
        dims = ("parallel", "parallel")

    out = pl.pallas_call(
        kernel,
        out_shape=jax.ShapeDtypeStruct((M, H), x.dtype),
        grid_spec=pltpu.PrefetchScalarGridSpec(
            num_scalar_prefetch=0,
            grid=grid,
            in_specs=in_specs,
            out_specs=out_specs,
        ),
        compiler_params=pltpu.CompilerParams(
            dimension_semantics=dims,
            vmem_limit_bytes=vmem_limit,
        ),
    )(*operands)

    return out.reshape(orig_shape)


class ResidualAddLinearGELU:
    """ResidualAdd(fn) with fn = Linear(H, H) + GELU, fused into one kernel.

    Parameter prep (bf16 weight cast, bias reshape) happens once here and is
    cached, so the per-call path launches exactly one pallas_call with no
    extra HBM copies.
    """

    def __init__(self, w, b):
        self.w_bf16 = jnp.asarray(w, dtype=jnp.bfloat16)            # one-time cast
        self.b_f32 = jnp.asarray(b, dtype=jnp.float32).reshape(1, -1)

    def __call__(self, x):
        return _residual_add_impl(x, self.w_bf16, self.b_f32)


# --------------------------------------------------------------------------
# Pure-JAX reference (f32 weights) and self-check
# --------------------------------------------------------------------------
def reference(x, w, b):
    xf = x.astype(jnp.float32)
    y = jnp.einsum("...h,hk->...k", xf, w.astype(jnp.float32))
    y = jax.nn.gelu(y + b.astype(jnp.float32), approximate=_APPROX_GELU)
    return (y + xf).astype(x.dtype)


if __name__ == "__main__":
    B, S, H = 2, 8, 128
    key = jax.random.PRNGKey(0)
    kx, kw, kb = jax.random.split(key, 3)

    x = jax.random.normal(kx, (B, S, H), dtype=jnp.float32)
    # Deterministic "fn" parameters (synthetic init, no checkpoint load).
    w = jax.random.normal(kw, (H, H), dtype=jnp.float32) * (1.0 / jnp.sqrt(H))
    b = jax.random.normal(kb, (H,), dtype=jnp.float32) * 0.01

    module = ResidualAddLinearGELU(w, b)
    out = module(x)
    jax.block_until_ready(out)

    ref = reference(x, w, b)
    assert out.shape == x.shape and out.dtype == x.dtype
    # bf16 MXU operands with f32 accumulation vs. pure-f32 reference.
    assert jnp.allclose(out, ref, atol=5e-2, rtol=5e-2), float(
        jnp.max(jnp.abs(out - ref)))
    print("KERNEL_OK")
</pallas_src>

<mosaic_0001>
module attributes {stable_mosaic.version = 11 : i64} {
  func.func @_fused_resident_kernel(%arg0: i32, %arg1: memref<8x128xf32, #tpu.memory_space<vmem>>, %arg2: memref<128x128xbf16, #tpu.memory_space<vmem>>, %arg3: memref<1x128xf32, #tpu.memory_space<vmem>>, %arg4: memref<8x128xf32, #tpu.memory_space<vmem>>) attributes {dimension_semantics = [#tpu.dimension_semantics<parallel>], iteration_bounds = array<i64: 2>, scalar_prefetch = 0 : i64, scratch_operands = 0 : i64, tpu.core_type = #tpu.core_type<tc>, window_params = [{transform_indices = @transform_0, window_bounds = array<i64: 8, 128>}, {pipeline_mode = #tpu.pipeline_mode<synchronous>, transform_indices = @transform_1, window_bounds = array<i64: 128, 128>}, {pipeline_mode = #tpu.pipeline_mode<synchronous>, transform_indices = @transform_2, window_bounds = array<i64: 1, 128>}, {transform_indices = @transform_3, window_bounds = array<i64: 8, 128>}]} {
    %c0 = arith.constant 0 : index
    %c0_0 = arith.constant 0 : index
    %0 = vector.load %arg1[%c0, %c0_0] : memref<8x128xf32, #tpu.memory_space<vmem>>, vector<8x128xf32>
    %1 = arith.truncf %0 : vector<8x128xf32> to vector<8x128xbf16>
    %c0_1 = arith.constant 0 : index
    %c0_2 = arith.constant 0 : index
    %2 = vector.load %arg2[%c0_1, %c0_2] : memref<128x128xbf16, #tpu.memory_space<vmem>>, vector<128x128xbf16>
    %cst = arith.constant dense<0.000000e+00> : vector<8x128xf32>
    %3 = tpu.matmul %1, %2, %cst {dimension_numbers = #tpu.dot_dimension_numbers<[1], [0], [0], [1], [0, 0, 1, 1], [], []>} : vector<8x128xbf16>, vector<128x128xbf16>, vector<8x128xf32> -> vector<8x128xf32>
    %c0_3 = arith.constant 0 : index
    %c0_4 = arith.constant 0 : index
    %4 = vector.load %arg3[%c0_3, %c0_4] : memref<1x128xf32, #tpu.memory_space<vmem>>, vector<1x128xf32>
    %5 = vector.broadcast %4 : vector<1x128xf32> to vector<8x128xf32>
    %6 = arith.addf %3, %5 : vector<8x128xf32>
    %7 = arith.mulf %6, %6 : vector<8x128xf32>
    %8 = arith.mulf %6, %7 : vector<8x128xf32>
    %cst_5 = arith.constant 4.471500e-02 : f32
    %9 = vector.broadcast %cst_5 : f32 to vector<8x128xf32>
    %10 = arith.mulf %9, %8 : vector<8x128xf32>
    %11 = arith.addf %6, %10 : vector<8x128xf32>
    %cst_6 = arith.constant 0.797884583 : f32
    %12 = vector.broadcast %cst_6 : f32 to vector<8x128xf32>
    %13 = arith.mulf %12, %11 : vector<8x128xf32>
    %14 = math.tanh %13 : vector<8x128xf32>
    %cst_7 = arith.constant 1.000000e+00 : f32
    %15 = vector.broadcast %cst_7 : f32 to vector<8x128xf32>
    %16 = arith.addf %15, %14 : vector<8x128xf32>
    %cst_8 = arith.constant 5.000000e-01 : f32
    %17 = vector.broadcast %cst_8 : f32 to vector<8x128xf32>
    %18 = arith.mulf %17, %16 : vector<8x128xf32>
    %19 = arith.mulf %6, %18 : vector<8x128xf32>
    %20 = arith.addf %19, %0 : vector<8x128xf32>
    %c0_9 = arith.constant 0 : index
    %c0_10 = arith.constant 0 : index
    %21 = vector.load %arg4[%c0_9, %c0_10] : memref<8x128xf32, #tpu.memory_space<vmem>>, vector<8x128xf32>
    tpu.vector_store %arg4[%c0_9, %c0_10], %20 {strides = array<i32>} : memref<8x128xf32, #tpu.memory_space<vmem>>, vector<8x128xf32>,
    return
  }
  func.func @transform_0(%arg0: i32) -> (i32, i32) {
    %c0_i32 = arith.constant 0 : i32
    %c0_i32_0 = arith.constant 0 : i32
    return %arg0, %c0_i32 : i32, i32
  }
  func.func @transform_1(%arg0: i32) -> (i32, i32) {
    %c0_i32 = arith.constant 0 : i32
    %c0_i32_0 = arith.constant 0 : i32
    %c0_i32_1 = arith.constant 0 : i32
    return %c0_i32, %c0_i32_0 : i32, i32
  }
  func.func @transform_2(%arg0: i32) -> (i32, i32) {
    %c0_i32 = arith.constant 0 : i32
    %c0_i32_0 = arith.constant 0 : i32
    %c0_i32_1 = arith.constant 0 : i32
    return %c0_i32, %c0_i32_0 : i32, i32
  }
  func.func @transform_3(%arg0: i32) -> (i32, i32) {
    %c0_i32 = arith.constant 0 : i32
    %c0_i32_0 = arith.constant 0 : i32
    return %arg0, %c0_i32 : i32, i32
  }
}

</mosaic_0001>

<bundles_post_ra>
// kernel: _residual_add_impl.1
= control target key start
LH: loop header
LB: loop body
LE: loop exit
PB: predicated region body
PF: predicated region fallthrough
CT: control target
= control target key end

     0   :  { %8 = vsyncpa [#allocation3], 0  ;;  %s903_s0 = inlined_call_operand.hbm [shape: f32[16,128], index: 0, kind: input, shape index: {}]   ;;  %s904_s1 = inlined_call_operand.hbm [shape: bf16[128,128], index: 1, kind: input, shape index: {}]   ;;  %s905_s2 = inlined_call_operand.vmem [shape: f32[1,128], index: 2, kind: input, shape index: {}]   ;;  %s906_s3 = inlined_call_operand.hbm [shape: f32[16,128], index: 3, kind: output, shape index: {}]  }
   0x1   :  { %10 = vsyncpa [#allocation3 + $0x1], 0 }
   0x2   :  { %11 = vsyncpa [#allocation6], 0 }
   0x3   :  { %12 = vsyncpa [#allocation4], 0 }
   0x4   :  { %14 = vsyncpa [#allocation4 + $0x1], 0  ;;  %s700_s12 = smov 0   ;;  %s702_s13 = smov 0  }
   0x5   :  { %s704_s14 = smov 0   ;;  %s706_s15 = smov 0  }
   0x6 LB: > { %s721_s16 = sadd.s32 4294967295, %s671_s15   ;;  %s420_s17 = sadd.s32 4294967294, %s671_s15   ;;  %s671_s15 = sphi %s706_s15, %s926_s15   ;;  %s667_s14 = sphi %s704_s14, %s925_s14   ;;  %s663_s13 = sphi %s702_s13, %s924_s13   ;;  %s659_s12 = sphi %s700_s12, %s923_s12  }
   0x7   : > { %p40_p0 = scmp.ne.s32.totalorder %s663_s13, %s659_s12  ;;  %p907_p1 = scmp.eq.s32.totalorder %s721_s16, 0 }
   0x8   : > { %p112_p3 = scmp.eq.s32.totalorder %s420_s17, 1  ;;  %p421_p5 = scmp.ge.s32.totalorder %s671_s15, 1 }
   0x9   : > { %p730_p4 = por %p907_p1, %p40_p0  ;;  %p119_p7 = scmp.lt.s32.totalorder %s671_s15, 3 }
   0xa   : > { %p735_p6 = por %p112_p3, %p40_p0  ;;  %s673_s21 = smov [#allocation5]  }
   0xb   : > { %s910_s18 = scalar_select %p730_p4, 1, 0 }
   0xc   : > { %s911_s19 = scalar_select %p735_p6, 1, 0 }
   0xd   : > { %p740_p8 = pnand %p421_p5, %p119_p7  ;;  %s131_s22 = sshll.u32 %s673_s21, 4  ;;  %s744_s22 = int_to_ptr.vmem [resolvable:$true] %s131_s22 }
   0xe   : > { %s756_s24 = sadd.s32 1, %s671_s15   ;;  %s27_s25 = sadd.s32 1, %s667_s14 }
   0xf   : > { %s912_s20 = scalar_select %p740_p8, 1, 0 }
  0x10   : > { %p480_p9 = pneg %p740_p8  ;;  %s24_s26 = ssub.s32 %s671_s15, %s756_s24 }
  0x11   : > { %s543_s29 = scalar_lea.hbm %s904_s1, 1024 }
  0x12   : > { %p751_p11 = pnand %p480_p9, %p907_p1  ;;  %p544_p12 = scmp.ne.s32.totalorder %s904_s1, %s543_s29 }
  0x13   : > { %p550_p5 = scmp.lt.u32.totalorder %s543_s29, %s904_s1 }
  0x14   : > { %p545_p13 = pneg %p751_p11 }
  0x16   : > { %p546_p0 = pnand %p545_p13, %p544_p12 }
  0x18   : > { %p547_p3 = pneg %p546_p0 }
  0x1a   : > { %p552_p7 = pnand %p550_p5, %p547_p3 }
  0x1c   : > { %555 = shalt.err (!%p552_p7)
}
  0x1d   : > { %s556_s7 = scalar_lea.vmem %s744_s22, 1024  ;;  %p564_p2 = scmp.lt.s32.totalorder %s744_s22, %s744_s22 }
  0x1e   : > { %p557_p9 = scmp.ne.s32.totalorder %s744_s22, %s556_s7  ;;  %p565_p6 = scmp.lt.s32.totalorder %s556_s7, %s556_s7 }
  0x20   : > { %p559_p10 = pnand %p557_p9, %p545_p13  ;;  %p566_p4 = por %p565_p6, %p564_p2 }
  0x22   : > { %p560_p1 = pneg %p559_p10 }
  0x24   : > { %p567_p8 = pnand %p566_p4, %p560_p1 }
  0x26   : > { %570 = shalt.err (!%p567_p8)
}
  0x27   : > { %s674_s8 = smov 64   ;;  %s675_s9 = smov 4  }
  0x28   : > { %483 = dma.hbm_to_vmem [thread:$0]  (!%p751_p11), %s904_s1, 1024, %s744_s22, [#allocation6], %s674_s8, %s674_s8, %s675_s9  }
  0x29   : > { %p25_p2 = scmp.eq.s32.totalorder %s24_s26, 0  ;;  %p34_p1 = scmp.ne.s32.totalorder %s667_s14, %s663_s13 }
  0x2a   : > { %p35_p4 = scmp.eq.s32.totalorder %s671_s15, 0  ;;  %p493_p6 = scmp.lt.s32.totalorder %s671_s15, 2 }
  0x2b   : > { %s787_s17 = scalar_select %p25_p2, %s667_s14, %s27_s25  }
  0x2c   : > { %p36_p8 = por %p35_p4, %p34_p1  ;;  %p914_p10 = scmp.eq.s32.totalorder %s721_s16, 1 }
  0x2d   : > { %s148_s27 = sand.u32 1, %s667_s14   ;;  %s425_s28 = sshll.u32 %s671_s15, 7 }
  0x2e   : > { %p791_p12 = por %p914_p10, %p34_p1  ;;  %s424_s29 = sshll.u32 %s148_s27, 3 }
  0x2f   : > { %s800_s4 = scalar_lea.hbm %s903_s0, %s425_s28  ;;  %s152_s22 = scalar_lea.vmem [#allocation2], %s424_s29 }
  0x30   : > { %s159_s25 = sshll.u32 %s152_s22, 4  ;;  %p802_p11 = pnand %p493_p6, %p36_p8  ;;  %s806_s25 = int_to_ptr.vmem [resolvable:$true] %s159_s25 }
  0x31   : > { %s149_s5 = scalar_lea.sflag [#allocation3], %s148_s27  ;;  %s571_s6 = scalar_lea.hbm %s800_s4, 128 }
  0x32   : > { %p572_p13 = scmp.ne.s32.totalorder %s800_s4, %s571_s6  ;;  %p573_p0 = pneg %p802_p11 }
  0x33   : > { %s576_s9 = scalar_lea.hbm %s903_s0, 256  ;;  %p577_p7 = scmp.lt.u32.totalorder %s800_s4, %s903_s0 }
  0x34   : > { %p574_p3 = pnand %p573_p0, %p572_p13  ;;  %p578_p9 = scmp.lt.u32.totalorder %s576_s9, %s571_s6 }
  0x35   : > { %p580_p1 = scmp.lt.u32.totalorder %s571_s6, %s800_s4 }
  0x36   : > { %p575_p5 = pneg %p574_p3  ;;  %p579_p2 = por %p578_p9, %p577_p7 }
  0x38   : > { %p581_p4 = por %p580_p1, %p579_p2 }
  0x3a   : > { %p582_p6 = pnand %p581_p4, %p575_p5 }
  0x3c   : > { %585 = shalt.err (!%p582_p6)
}
  0x3d   : > { %s586_s27 = scalar_lea.vmem %s806_s25, 128  ;;  %s676_s28 = smov [#allocation2]  }
  0x3e   : > { %p587_p8 = scmp.ne.s32.totalorder %s806_s25, %s586_s27  ;;  %s591_s29 = sshll.u32 %s676_s28, 4  ;;  %s592_s29 = int_to_ptr.vmem [resolvable:$false] %s591_s29 }
  0x3f   : > { %s593_s23 = scalar_lea.vmem %s592_s29, 256  ;;  %p594_p3 = scmp.lt.s32.totalorder %s806_s25, %s592_s29 }
  0x40   : > { %p589_p10 = pnand %p587_p8, %p573_p0  ;;  %p595_p7 = scmp.lt.s32.totalorder %s593_s23, %s586_s27 }
  0x42   : > { %p590_p13 = pneg %p589_p10  ;;  %p596_p9 = por %p595_p7, %p594_p3 }
  0x44   : > { %p597_p2 = pnand %p596_p9, %p590_p13 }
  0x46   : > { %600 = shalt.err (!%p597_p2)
}
  0x47   : > { %487 = dma.hbm_to_vmem [thread:$0]  (!%p802_p11), %s800_s4, 128, %s806_s25, %s149_s5  }
  0x48   : > { %p917_p5 = scmp.ne.s32.totalorder %s912_s20, 0 }
  0x49   : > { %s836_s30 = sand.u32 (!%p917_p5), 1, %s663_s13   ;;  %p918_p0 = scmp.ne.s32.totalorder (!%p917_p5), %s910_s18, 0 }
  0x4a   : > { %168 = sbr.rel (%p917_p5) target bundleno = 375 (0x177), region = 32  ;;  %s427_s22 = sshll.u32 (!%p917_p5), %s836_s30, 3 }
  0x4b   : > { %s171_s6 = scalar_lea.sflag (!%p917_p5), [#allocation3], %s836_s30  ;;  %s174_s7 = scalar_lea.vmem (!%p917_p5), [#allocation2], %s427_s22 }
  0x51   : > { %646 = dma.done.wait (%p918_p0), %s171_s6, 128  }
  0x52   : > { %648 = vsyncadd (%p918_p0), %s171_s6, 4294967168  ;;  %p919_p11 = scmp.eq.s32.totalorder %s721_s16, 0 }
  0x54   : > { %650 = dma.done.wait (%p919_p11), [#allocation6], 1024   ;;  %p920_p1 = pmov %p919_p11 }
  0x55   : > { %v677_v0 = vmov 0.0   ;;  %vm678_vm0 = vmmov 0   ;;  %v533_v1 = vld [vmem:[#allocation5] sm:$0xff]   ;;  %v534_v2 = vld [vmem:[#allocation5 + $0x8] sm:$0xff]   ;;  %v535_v3 = vld [vmem:[#allocation5 + $0x10] sm:$0xff]   ;;  %s440_s4 = sshll.u32 %s721_s16, 7 }
  0x56   : > { %652 = vsyncadd (%p920_p1), [#allocation6], 4294966272  ;;  %452 = vmatprep.subr.bf16.mxu0 %v677_v0  ;;  %468 = vmatprep.mubr.msk.bf16.mxu0 %vm678_vm0, %v677_v0  ;;  %v536_v4 = vld [vmem:[#allocation5 + $0x18] sm:$0xff]   ;;  %v537_v5 = vld [vmem:[#allocation5 + $0x20] sm:$0xff]   ;;  %s200_s25 = scalar_lea.vmem [#allocation7], %s427_s22  ;;  %s859_s9 = scalar_lea.hbm %s906_s3, %s440_s4 }
  0x57   : > { %453 = vmatpush3.bf16.msra.mxu0 %v533_v1  ;;  %v538_v6 = vld [vmem:[#allocation5 + $0x28] sm:$0xff]   ;;  %v539_v7 = vld [vmem:[#allocation5 + $0x30] sm:$0xff]   ;;  %v540_v8 = vld [vmem:[#allocation5 + $0x38] sm:$0xff]   ;;  %s340_s26 = sshll.u32 %s200_s25, 4  ;;  %s327_s10 = scalar_lea.sflag [#allocation4], %s836_s30  ;;  %s861_s26 = int_to_ptr.vmem [resolvable:$true] %s340_s26 }
  0x58   : > { %454 = vmatprep.subr.bf16.mxu0 %v677_v0  ;;  %v202_v9 = vld [vmem:[%s174_s7] sm:$0xff]  ;;  %s601_s11 = scalar_lea.vmem %s861_s26, 128  ;;  %s679_s16 = smov [#allocation7]  }
  0x59   : > { %v203_v10 = vpack.c.bf16 %v202_v9, %v202_v9  ;;  %v430_v11 = vld [vmem:[%s905_s2] ss:$0 sm:$0xff]  ;;  %p602_p4 = scmp.ne.s32.totalorder %s861_s26, %s601_s11  ;;  %s605_s27 = sshll.u32 %s679_s16, 4  ;;  %s606_s27 = int_to_ptr.vmem [resolvable:$false] %s605_s27 }
  0x5a   : > { %s607_s28 = scalar_lea.vmem %s606_s27, 256  ;;  %p608_p10 = scmp.lt.s32.totalorder %s861_s26, %s606_s27 }
  0x5b   : > { %455 = vmatpush3.bf16.msra.mxu0 %v534_v2  ;;  %p603_p6 = pnand %p602_p4, %p791_p12  ;;  %p609_p13 = scmp.lt.s32.totalorder %s607_s28, %s601_s11 }
  0x5c   : > { %456 = vmatprep.subr.bf16.mxu0 %v677_v0 }
  0x5d   : > { %p604_p8 = pneg %p603_p6  ;;  %p610_p3 = por %p609_p13, %p608_p10 }
  0x5f   : > { %457 = vmatpush3.bf16.msra.mxu0 %v535_v3  ;;  %p611_p7 = pnand %p610_p3, %p604_p8 }
  0x60   : > { %458 = vmatprep.subr.bf16.mxu0 %v677_v0 }
  0x63   : > { %459 = vmatpush3.bf16.msra.mxu0 %v536_v4 }
  0x64   : > { %460 = vmatprep.subr.bf16.mxu0 %v677_v0 }
  0x67   : > { %461 = vmatpush3.bf16.msra.mxu0 %v537_v5 }
  0x68   : > { %462 = vmatprep.subr.bf16.mxu0 %v677_v0 }
  0x6b   : > { %463 = vmatpush3.bf16.msra.mxu0 %v538_v6 }
  0x6c   : > { %464 = vmatprep.subr.bf16.mxu0 %v677_v0 }
  0x6f   : > { %465 = vmatpush3.bf16.msra.mxu0 %v539_v7 }
  0x70   : > { %466 = vmatprep.subr.bf16.mxu0 %v677_v0 }
  0x73   : > { %467 = vmatpush3.bf16.msra.mxu0 %v540_v8 }
  0x76   : > { %469 = vmatmul.mubr.bf16.vlgmr.msra.gmra.mrb[0].mxu0 %v203_v10 }
 0x149   : > { %v309_v12 = vpop.f32.mrb[0].mxu0 }
 0x14a   : > { %v310_v13 = vadd.f32 %v430_v11, %v309_v12  ;;  %v470_v14 = vpop.f32.mrb[1].mxu0 }
 0x14b   : > { %v312_v15 = vpop.f32.mrb[2].mxu0 }
 0x14c   : > { %v315_v16 = vmul.f32 %v310_v13, %v310_v13  ;;  %v471_v17 = vpop.f32.mrb[3].mxu0 }
 0x14e   : > { %v316_v18 = vmul.f32 %v315_v16, %v310_v13 }
 0x150   : > { %v317_v19 = vmul.f32 0.044715, %v316_v18 }
 0x152   : > { %v318_v20 = vadd.f32 %v317_v19, %v310_v13 }
 0x154   : > { %v319_v21 = vmul.f32 0.7978846, %v318_v20 }
 0x156   : > { %541 = vtanh.f32 %v319_v21 }
 0x160   : > { %v542_v22 = vpop.eup %541 }
 0x161   : > { %v321_v23 = vadd.f32 1.0, %v542_v22 }
 0x163   : > { %v322_v24 = vmul.f32 0.5, %v321_v23 }
 0x165   : > { %v323_v25 = vmul.f32 %v322_v24, %v310_v13 }
 0x167   : > { %v324_v26 = vadd.f32 %v323_v25, %v202_v9 }
 0x169   : > { %325 = vst [vmem:[%s200_s25] sm:$0xff] %v324_v26 }
 0x16a   : > { %614 = shalt.err (!%p611_p7)
}
 0x16b   : > { %s615_s29 = scalar_lea.hbm %s859_s9, 128  ;;  %s619_s22 = scalar_lea.hbm %s906_s3, 256 }
 0x16c   : > { %p616_p9 = scmp.ne.s32.totalorder %s859_s9, %s615_s29  ;;  %p620_p0 = scmp.lt.u32.totalorder %s859_s9, %s906_s3 }
 0x16d   : > { %p621_p11 = scmp.lt.u32.totalorder %s619_s22, %s615_s29  ;;  %p623_p4 = scmp.lt.u32.totalorder %s615_s29, %s859_s9 }
 0x16e   : > { %p617_p2 = pnand %p616_p9, %p791_p12 }
 0x16f   : > { %p622_p1 = por %p621_p11, %p620_p0 }
 0x170   : > { %p618_p5 = pneg %p617_p2 }
 0x171   : > { %p624_p6 = por %p623_p4, %p622_p1 }
 0x173   : > { %p625_p8 = pnand %p624_p6, %p618_p5 }
 0x175   : > { %628 = shalt.err (!%p625_p8)
}
 0x176   : > { %478 = dma.vmem_to_hbm [thread:$0]  (%p791_p12), %s861_s26, 128, %s859_s9, %s327_s10  }
 0x177 PF: > { %s352_s18 = sand.u32 1, %s659_s12   ;;  %p921_p10 = scmp.ne.s32.totalorder %s911_s19, 0 }
 0x178   : > { %p922_p13 = scmp.ge.s32.totalorder %s671_s15, 2  ;;  %s353_s20 = scalar_lea.sflag [#allocation4], %s352_s18 }
 0x17a   : > { %p489_p3 = pnand %p922_p13, %p921_p10 }
 0x17c   : > { %654 = dma.done.wait (!%p489_p3), %s353_s20, 128  }
 0x17d   : > { %656 = vsyncadd (!%p489_p3), %s353_s20, 4294967168  ;;  %p17_p7 = scmp.ge.s32.totalorder %s756_s24, 4   ;;  %s923_s12 = smov %s663_s13 }
 0x17e   : > { %s924_s13 = smov %s667_s14  ;;  %s925_s14 = smov %s787_s17 }
 0x17f   : > { %s926_s15 = smov %s756_s24  ;;  %19 = sbr.rel (!%p17_p7) target bundleno = 6 (0x6), region = 81 }
 0x186   :  { %358 = vsyncpa [#allocation3], 1 }
 0x187   :  { %360 = vsyncpa [#allocation3 + $0x1], 1 }
 0x188   :  { %361 = vsyncpa [#allocation6], 1 }
 0x189   :  { %362 = vsyncpa [#allocation4], 1 }
 0x18a   :  { %364 = vsyncpa [#allocation4 + $0x1], 1 }

</bundles_post_ra>
